<compile_context>
chip_gen: v7x
topology: tpu7x:2x2x1
jax: 0.10.0
libtpu: 0.0.40
codegen_flags: <defaults>
</compile_context>

<pallas_src>
import functools
import math

import jax
import jax.numpy as jnp
from jax import lax
from jax.experimental import pallas as pl
from jax.experimental.pallas import tpu as pltpu


def get_num_patches(image_size: int, patch_size: int) -> int:
    return (image_size // patch_size) ** 2


def _round_up(x: int, m: int) -> int:
    return ((x + m - 1) // m) * m


def _lcm(a: int, b: int) -> int:
    return a * b // math.gcd(a, b)


def patchify(x: jnp.ndarray, patch_size: int) -> jnp.ndarray:
    """(B, 3, H, W) -> (B, N, 3*P*P), channel-major per-patch flatten."""
    B, C, H, W = x.shape
    P = patch_size
    x = x.reshape(B, C, H // P, P, W // P, P)
    x = jnp.transpose(x, (0, 2, 4, 1, 3, 5))          # (B, H/P, W/P, C, P, P)
    return x.reshape(B, (H // P) * (W // P), C * P * P)


def _tokenizer_kernel(p_ref, w_ref, b_ref, g_ref, bp_ref, o_ref, *, inv_d, eps):
    # p_ref : (tm, Dp)  patch rows (flattened over batch*patches), compute dtype
    # w_ref : (Dp, D)   linear weight, transposed            (constant tile)
    # b_ref : (1, D)    linear bias, f32                     (constant tile)
    # g_ref : (1, D)    layernorm gamma, f32                 (constant tile)
    # bp_ref: (tm, D)   layernorm beta + pos_embed, f32      (constant tile)
    # o_ref : (tm, D)   output token rows (f32 or bf16)
    t = jnp.dot(p_ref[...], w_ref[...], preferred_element_type=jnp.float32)
    t = t + b_ref[...]                                   # broadcast (1, D), f32
    # LayerNorm statistics in f32, centered two-pass variance (matches the
    # reference numerics; two XLU reductions, 1/D hoisted as a constant).
    mean = jnp.sum(t, axis=-1, keepdims=True) * inv_d
    centered = t - mean
    var = jnp.sum(centered * centered, axis=-1, keepdims=True) * inv_d
    t_norm = centered * lax.rsqrt(var + eps)             # rsqrt -> EUP slot
    out = t_norm * g_ref[...] + bp_ref[...]
    o_ref[...] = out.astype(o_ref.dtype)


def prepare_tokenizer_params(weight, bias, gamma, beta, pos_embed,
                             *, compute_dtype=jnp.float32):
    """One-time prep hoisted out of the per-call forward: W^T (+ optional bf16
    cast) and the (N, D) beta+pos table (kept f32: added after normalization)."""
    D, Dp = weight.shape
    N = pos_embed.shape[-2]
    w_t = jnp.asarray(weight).T.astype(compute_dtype)                  # (Dp, D)
    b2 = jnp.asarray(bias).reshape(1, D).astype(jnp.float32)
    g2 = jnp.asarray(gamma).reshape(1, D).astype(jnp.float32)
    posb = (jnp.asarray(pos_embed).reshape(N, D)
            + jnp.asarray(beta).reshape(1, D)).astype(jnp.float32)     # (N, D)
    return {"w_t": w_t, "b2": b2, "g2": g2, "posb": posb}


@functools.partial(
    jax.jit,
    static_argnames=("patch_size", "compute_dtype", "out_dtype", "eps",
                     "max_rows_per_block"))
def tokenizer_forward(x, w_t, b2, g2, posb, *, patch_size,
                      compute_dtype=jnp.float32, out_dtype=None,
                      eps=1e-5, max_rows_per_block=1024):
    """x: (B, 3, H, W) -> tokens (B, N, D)."""
    B, C, H, W = x.shape
    if C != 3:
        raise ValueError(f"Expected 3 channels, got {C}")
    out_dtype = jnp.dtype(compute_dtype) if out_dtype is None else jnp.dtype(out_dtype)
    Dp, D = w_t.shape
    N = posb.shape[0]
    rows = B * N

    # patchify + cast + flatten fuse into one XLA op under jit.
    patches = patchify(x, patch_size).astype(compute_dtype).reshape(rows, Dp)

    in_b = jnp.dtype(compute_dtype).itemsize
    out_b = out_dtype.itemsize
    sublane = 16 if in_b == 2 else 8              # bf16 packs 2 rows per sublane

    # Row block size: multiple of N (so beta+pos is one constant VMEM tile) and
    # of the sublane packing; capped by a conservative VMEM budget that fits
    # every generation; forced to >= 2 grid steps when possible so the
    # "parallel" row axis can shard across the two v7x TensorCores.
    unit = _lcm(sublane, N)
    bytes_per_row = (2 * Dp * in_b          # double-buffered patch tile
                     + D * 4                # constant beta+pos tile
                     + 2 * D * out_b        # double-buffered output tile
                     + 4 * D * 4)           # ~4 tile-sized f32 temporaries
    vmem_row_budget = 24 << 20
    cap = max(unit, min(max_rows_per_block, vmem_row_budget // bytes_per_row))
    max_units = max(1, cap // unit)
    rows_units = pl.cdiv(rows, unit)
    units_per_block = min(max_units, rows_units)
    if rows_units >= 2 and pl.cdiv(rows_units, units_per_block) < 2:
        units_per_block = pl.cdiv(rows_units, 2)  # >= 2 steps for megacore
    tm = units_per_block * unit
    rows_p = _round_up(rows, tm)
    grid_m = rows_p // tm

    if rows_p != rows:
        patches = jnp.pad(patches, ((0, rows_p - rows), (0, 0)))

    # Constant (tm, D) beta+pos tile: tm is a multiple of N, so every row block
    # starts at patch index 0 and reuses the same VMEM-resident tile.
    bp = jnp.tile(posb, (tm // N, 1))

    vmem_est = (2 * tm * Dp * in_b + Dp * D * in_b + 2 * D * 4
                + tm * D * 4 + 2 * tm * D * out_b + 4 * tm * D * 4)
    vmem_limit = int(min(64 << 20, max(32 << 20, 2 * vmem_est)))

    kernel = functools.partial(_tokenizer_kernel,
                               inv_d=1.0 / float(D), eps=float(eps))

    out = pl.pallas_call(
        kernel,
        out_shape=jax.ShapeDtypeStruct((rows_p, D), out_dtype),
        grid_spec=pltpu.PrefetchScalarGridSpec(
            num_scalar_prefetch=0,
            grid=(grid_m,),
            in_specs=[
                pl.BlockSpec((tm, Dp), lambda i: (i, 0)),   # patch rows (tiled)
                pl.BlockSpec((Dp, D), lambda i: (0, 0)),    # W^T       (constant)
                pl.BlockSpec((1, D), lambda i: (0, 0)),     # bias      (constant)
                pl.BlockSpec((1, D), lambda i: (0, 0)),     # gamma     (constant)
                pl.BlockSpec((tm, D), lambda i: (0, 0)),    # beta+pos  (constant)
            ],
            out_specs=pl.BlockSpec((tm, D), lambda i: (i, 0)),
        ),
        compiler_params=pltpu.CompilerParams(
            dimension_semantics=("parallel",),
            vmem_limit_bytes=vmem_limit),
    )(patches, w_t, b2, g2, bp)

    if rows_p != rows:
        out = out[:rows]
    return out.reshape(B, N, D)


def reference_forward(x, weight, bias, gamma, beta, pos_embed, patch_size, eps=1e-5):
    patches = patchify(x, patch_size)
    t = patches @ weight.T + bias
    mean = jnp.mean(t, axis=-1, keepdims=True)
    var = jnp.mean(jnp.square(t - mean), axis=-1, keepdims=True)
    t = (t - mean) / jnp.sqrt(var + eps)
    return t * gamma + beta + pos_embed


if __name__ == "__main__":
    patch_size = 4

    def make_inputs(key, B, image_size, D):
        N = get_num_patches(image_size, patch_size)
        Dp = 3 * patch_size * patch_size
        kx, kw, kb, kp = jax.random.split(key, 4)
        x = jax.random.normal(kx, (B, 3, image_size, image_size), jnp.float32)
        bound = 1.0 / jnp.sqrt(jnp.float32(Dp))          # nn.Linear default init
        weight = jax.random.uniform(kw, (D, Dp), jnp.float32, -bound, bound)
        bias = jax.random.uniform(kb, (D,), jnp.float32, -bound, bound)
        gamma = jnp.ones((D,), jnp.float32)
        beta = jnp.zeros((D,), jnp.float32)
        pos_embed = jax.random.normal(kp, (1, N, D), jnp.float32)
        return x, weight, bias, gamma, beta, pos_embed

    def run(x, w, b, g, be, pos, *, compute_dtype, out_dtype):
        p = prepare_tokenizer_params(w, b, g, be, pos, compute_dtype=compute_dtype)
        out = tokenizer_forward(
            x, p["w_t"], p["b2"], p["g2"], p["posb"],
            patch_size=patch_size, compute_dtype=compute_dtype,
            out_dtype=out_dtype, eps=1e-5, max_rows_per_block=1024)
        return jax.block_until_ready(out)

    # 1) Lane-dense primary config (D=128), f32: tm=16, grid=(2,) so the
    #    multi-step pipeline and the megacore-parallel row axis are exercised.
    B, image_size, D = 2, 16, 128
    x, w, b, g, be, pos = make_inputs(jax.random.PRNGKey(0), B, image_size, D)
    out = run(x, w, b, g, be, pos, compute_dtype=jnp.float32, out_dtype=jnp.float32)
    ref = reference_forward(x, w, b, g, be, pos, patch_size)
    assert out.shape == (B, get_num_patches(image_size, patch_size), D)
    assert jnp.allclose(out, ref, atol=1e-5, rtol=1e-5), "f32 D=128 mismatch"

    # 2) bf16 matmul operands + bf16 token output (mem-bound fast path on
    #    v6e/v7x); LayerNorm stats and beta+pos stay in f32.
    out_bf16 = run(x, w, b, g, be, pos,
                   compute_dtype=jnp.bfloat16, out_dtype=jnp.bfloat16)
    assert out_bf16.dtype == jnp.bfloat16
    assert jnp.allclose(out_bf16.astype(jnp.float32), ref,
                        atol=5e-2, rtol=5e-2), "bf16 mismatch"

    # 3) Larger config (B=4, 32x32 image, D=256): tm=128, beta+pos tiled 2x per
    #    block, multiple patches per block, still 2 balanced grid steps.
    B2, image_size2, D2 = 4, 32, 256
    x2, w2, b2_, g2_, be2, pos2 = make_inputs(jax.random.PRNGKey(1), B2, image_size2, D2)
    out2 = run(x2, w2, b2_, g2_, be2, pos2,
               compute_dtype=jnp.float32, out_dtype=jnp.float32)
    ref2 = reference_forward(x2, w2, b2_, g2_, be2, pos2, patch_size)
    assert out2.shape == (B2, get_num_patches(image_size2, patch_size), D2)
    assert jnp.allclose(out2, ref2, atol=1e-5, rtol=1e-5), "f32 D=256 mismatch"

    # 4) Non-multiple-of-128 interface_dim stays correct (lane-sparse stores;
    #    production configs should keep D a multiple of 128).
    B3, image_size3, D3 = 2, 16, 32
    x3, w3, b3, g3, be3, pos3 = make_inputs(jax.random.PRNGKey(2), B3, image_size3, D3)
    out3 = run(x3, w3, b3, g3, be3, pos3,
               compute_dtype=jnp.float32, out_dtype=jnp.float32)
    ref3 = reference_forward(x3, w3, b3, g3, be3, pos3, patch_size)
    assert jnp.allclose(out3, ref3, atol=1e-5, rtol=1e-5), "f32 D=32 mismatch"

    print("KERNEL_OK")
</pallas_src>

<mosaic_0001>
module attributes {stable_mosaic.version = 11 : i64} {
  func.func @_tokenizer_kernel(%arg0: i32, %arg1: memref<16x48xf32, #tpu.memory_space<vmem>>, %arg2: memref<48x128xf32, #tpu.memory_space<vmem>>, %arg3: memref<1x128xf32, #tpu.memory_space<vmem>>, %arg4: memref<1x128xf32, #tpu.memory_space<vmem>>, %arg5: memref<16x128xf32, #tpu.memory_space<vmem>>, %arg6: memref<16x128xf32, #tpu.memory_space<vmem>>) attributes {dimension_semantics = [#tpu.dimension_semantics<parallel>], iteration_bounds = array<i64: 2>, scalar_prefetch = 0 : i64, scratch_operands = 0 : i64, tpu.core_type = #tpu.core_type<tc>, window_params = [{transform_indices = @transform_0, window_bounds = array<i64: 16, 48>}, {pipeline_mode = #tpu.pipeline_mode<synchronous>, transform_indices = @transform_1, window_bounds = array<i64: 48, 128>}, {pipeline_mode = #tpu.pipeline_mode<synchronous>, transform_indices = @transform_2, window_bounds = array<i64: 1, 128>}, {pipeline_mode = #tpu.pipeline_mode<synchronous>, transform_indices = @transform_3, window_bounds = array<i64: 1, 128>}, {pipeline_mode = #tpu.pipeline_mode<synchronous>, transform_indices = @transform_4, window_bounds = array<i64: 16, 128>}, {transform_indices = @transform_5, window_bounds = array<i64: 16, 128>}]} {
    %c0 = arith.constant 0 : index
    %c0_0 = arith.constant 0 : index
    %0 = vector.load %arg1[%c0, %c0_0] : memref<16x48xf32, #tpu.memory_space<vmem>>, vector<16x48xf32>
    %c0_1 = arith.constant 0 : index
    %c0_2 = arith.constant 0 : index
    %1 = vector.load %arg2[%c0_1, %c0_2] : memref<48x128xf32, #tpu.memory_space<vmem>>, vector<48x128xf32>
    %cst = arith.constant dense<0.000000e+00> : vector<16x128xf32>
    %2 = tpu.matmul %0, %1, %cst {dimension_numbers = #tpu.dot_dimension_numbers<[1], [0], [0], [1], [0, 0, 1, 1], [], []>} : vector<16x48xf32>, vector<48x128xf32>, vector<16x128xf32> -> vector<16x128xf32>
    %c0_3 = arith.constant 0 : index
    %c0_4 = arith.constant 0 : index
    %3 = vector.load %arg3[%c0_3, %c0_4] : memref<1x128xf32, #tpu.memory_space<vmem>>, vector<1x128xf32>
    %4 = vector.broadcast %3 : vector<1x128xf32> to vector<16x128xf32>
    %5 = arith.addf %2, %4 : vector<16x128xf32>
    %cst_5 = arith.constant dense<0.000000e+00> : vector<16xf32>
    %6 = vector.multi_reduction <add>, %5, %cst_5 [1] : vector<16x128xf32> to vector<16xf32>
    %7 = vector.shape_cast %6 : vector<16xf32> to vector<16x1xf32>
    %cst_6 = arith.constant 7.812500e-03 : f32
    %8 = vector.broadcast %cst_6 : f32 to vector<16x1xf32>
    %9 = arith.mulf %7, %8 : vector<16x1xf32>
    %10 = vector.broadcast %9 : vector<16x1xf32> to vector<16x128xf32>
    %11 = arith.subf %5, %10 : vector<16x128xf32>
    %12 = arith.mulf %11, %11 : vector<16x128xf32>
    %cst_7 = arith.constant dense<0.000000e+00> : vector<16xf32>
    %13 = vector.multi_reduction <add>, %12, %cst_7 [1] : vector<16x128xf32> to vector<16xf32>
    %14 = vector.shape_cast %13 : vector<16xf32> to vector<16x1xf32>
    %cst_8 = arith.constant 7.812500e-03 : f32
    %15 = vector.broadcast %cst_8 : f32 to vector<16x1xf32>
    %16 = arith.mulf %14, %15 : vector<16x1xf32>
    %cst_9 = arith.constant 9.99999974E-6 : f32
    %17 = vector.broadcast %cst_9 : f32 to vector<16x1xf32>
    %18 = arith.addf %16, %17 : vector<16x1xf32>
    %19 = math.rsqrt %18 : vector<16x1xf32>
    %20 = vector.broadcast %19 : vector<16x1xf32> to vector<16x128xf32>
    %21 = arith.mulf %11, %20 : vector<16x128xf32>
    %c0_10 = arith.constant 0 : index
    %c0_11 = arith.constant 0 : index
    %22 = vector.load %arg4[%c0_10, %c0_11] : memref<1x128xf32, #tpu.memory_space<vmem>>, vector<1x128xf32>
    %23 = vector.broadcast %22 : vector<1x128xf32> to vector<16x128xf32>
    %24 = arith.mulf %21, %23 : vector<16x128xf32>
    %c0_12 = arith.constant 0 : index
    %c0_13 = arith.constant 0 : index
    %25 = vector.load %arg5[%c0_12, %c0_13] : memref<16x128xf32, #tpu.memory_space<vmem>>, vector<16x128xf32>
    %26 = arith.addf %24, %25 : vector<16x128xf32>
    %c0_14 = arith.constant 0 : index
    %c0_15 = arith.constant 0 : index
    %27 = vector.load %arg6[%c0_14, %c0_15] : memref<16x128xf32, #tpu.memory_space<vmem>>, vector<16x128xf32>
    tpu.vector_store %arg6[%c0_14, %c0_15], %26 {strides = array<i32>} : memref<16x128xf32, #tpu.memory_space<vmem>>, vector<16x128xf32>,
    return
  }
  func.func @transform_0(%arg0: i32) -> (i32, i32) {
    %c0_i32 = arith.constant 0 : i32
    %c0_i32_0 = arith.constant 0 : i32
    return %arg0, %c0_i32 : i32, i32
  }
  func.func @transform_1(%arg0: i32) -> (i32, i32) {
    %c0_i32 = arith.constant 0 : i32
    %c0_i32_0 = arith.constant 0 : i32
    %c0_i32_1 = arith.constant 0 : i32
    return %c0_i32, %c0_i32_0 : i32, i32
  }
  func.func @transform_2(%arg0: i32) -> (i32, i32) {
    %c0_i32 = arith.constant 0 : i32
    %c0_i32_0 = arith.constant 0 : i32
    %c0_i32_1 = arith.constant 0 : i32
    return %c0_i32, %c0_i32_0 : i32, i32
  }
  func.func @transform_3(%arg0: i32) -> (i32, i32) {
    %c0_i32 = arith.constant 0 : i32
    %c0_i32_0 = arith.constant 0 : i32
    %c0_i32_1 = arith.constant 0 : i32
    return %c0_i32, %c0_i32_0 : i32, i32
  }
  func.func @transform_4(%arg0: i32) -> (i32, i32) {
    %c0_i32 = arith.constant 0 : i32
    %c0_i32_0 = arith.constant 0 : i32
    %c0_i32_1 = arith.constant 0 : i32
    return %c0_i32, %c0_i32_0 : i32, i32
  }
  func.func @transform_5(%arg0: i32) -> (i32, i32) {
    %c0_i32 = arith.constant 0 : i32
    %c0_i32_0 = arith.constant 0 : i32
    return %arg0, %c0_i32 : i32, i32
  }
}

</mosaic_0001>

<bundles_post_ra>
// kernel: tokenizer_forward.1
= control target key start
LH: loop header
LB: loop body
LE: loop exit
PB: predicated region body
PF: predicated region fallthrough
CT: control target
= control target key end

     0   :  { %10 = vsyncpa [#allocation3], 0  ;;  %s762_s0 = inlined_call_operand.vmem [shape: f32[32,48], index: 0, kind: input, shape index: {}]   ;;  %s763_s1 = inlined_call_operand.vmem [shape: f32[48,128], index: 1, kind: input, shape index: {}]   ;;  %s764_s2 = inlined_call_operand.vmem [shape: f32[1,128], index: 2, kind: input, shape index: {}]   ;;  %s765_s3 = inlined_call_operand.vmem [shape: f32[1,128], index: 3, kind: input, shape index: {}]   ;;  %s766_s4 = inlined_call_operand.vmem [shape: f32[16,128], index: 4, kind: input, shape index: {}]   ;;  %s767_s5 = inlined_call_operand.hbm [shape: f32[32,128], index: 5, kind: output, shape index: {}]  }
   0x1   :  { %12 = vsyncpa [#allocation3 + $0x1], 0  ;;  %s630_s18 = smov 0   ;;  %s632_s19 = smov 0  }
   0x2   :  { %s634_s20 = smov 0   ;;  %s636_s21 = smov 0  }
   0x3 LB: > { %s651_s22 = sadd.s32 4294967295, %s595_s21   ;;  %s436_s23 = sadd.s32 4294967294, %s595_s21   ;;  %s595_s21 = sphi %s636_s21, %s773_s21   ;;  %s591_s20 = sphi %s634_s20, %s772_s20   ;;  %s587_s19 = sphi %s632_s19, %s771_s19   ;;  %s583_s18 = sphi %s630_s18, %s770_s18  }
   0x4   : > { %s655_s24 = sadd.s32 1, %s595_s21   ;;  %s135_s25 = sadd.s32 1, %s591_s20 }
   0x5   : > { %s132_s26 = ssub.s32 %s595_s21, %s655_s24  ;;  %p145_p0 = scmp.ne.s32.totalorder %s591_s20, %s587_s19 }
   0x6   : > { %p133_p1 = scmp.eq.s32.totalorder %s132_s26, 0  ;;  %p146_p2 = scmp.eq.s32.totalorder %s651_s22, 1 }
   0x7   : > { %p151_p3 = scmp.ne.s32.totalorder %s587_s19, %s583_s18  ;;  %p152_p4 = scmp.eq.s32.totalorder %s436_s23, 1 }
   0x8   : > { %s666_s27 = scalar_select %p133_p1, %s591_s20, %s135_s25  }
   0x9   : > { %p668_p5 = por %p146_p2, %p145_p0  ;;  %p672_p6 = por %p152_p4, %p151_p3 }
   0xa   : > { %p439_p7 = scmp.ge.s32.totalorder %s595_s21, 1  ;;  %p191_p8 = scmp.lt.s32.totalorder %s595_s21, 3 }
   0xc   : > { %p192_p9 = pnand %p439_p7, %p191_p8 }
   0xd   : > { %v228_v0 = vld [vmem:[%s763_s1] sm:$0xff] (!%p192_p9)  ;;  %v229_v1 = vld [vmem:[%s763_s1 + $0x8] sm:$0xff] (!%p192_p9)  ;;  %v230_v2 = vld [vmem:[%s763_s1 + $0x10] sm:$0xff] (!%p192_p9)  ;;  %s441_s11 = sshll.u32 (!%p192_p9), %s651_s22, 1  ;;  %vm241_vm0 = vcmask (!%p192_p9), 392192   ;;  %s216_s8 = sand.u32 (!%p192_p9), 1, %s587_s19  }
   0xe   : > { %195 = sbr.rel (%p192_p9) target bundleno = 573 (0x23d), region = 40  ;;  %v476_v3 = vpack.c.bf16 (!%p192_p9), %v229_v1, %v228_v0  ;;  %v231_v4 = vld [vmem:[%s763_s1 + $0x18] sm:$0xff] (!%p192_p9)  ;;  %p220_p10 = scmp.lt.s32.totalorder (!%p192_p9), %s441_s11, 3  ;;  %v232_v6 = vld [vmem:[%s763_s1 + $0x20] sm:$0xff] (!%p192_p9)  ;;  %v233_v7 = vld [vmem:[%s763_s1 + $0x28] sm:$0xff] (!%p192_p9) }
   0xf   : > { %v480_v5 = vpack.c.bf16 (!%p192_p9), %v231_v4, %v230_v2  ;;  %v484_v8 = vpack.c.bf16 (!%p192_p9), %v233_v7, %v232_v6  ;;  %v443_v11 = vld [vmem:[%s764_s2] ss:$0 sm:$0xff] (!%p192_p9)  ;;  %s452_s14 = sshll.u32 (!%p192_p9), %s651_s22, 8  ;;  %v355_v38 = vld [vmem:[%s766_s4 + $0x8] sm:$0xff] (!%p192_p9)  ;;  %s721_s22 = scalar_lea.sflag (!%p192_p9), [#allocation3], %s216_s8 }
  0x10   : > { %477 = vmatprep.subr.bf16.mxu0 (!%p192_p9), %v476_v3  ;;  %v446_v31 = vld [vmem:[%s765_s3] ss:$0 sm:$0xff] (!%p192_p9)  ;;  %s597_s7 = smov (!%p192_p9), [#allocation2]  }
  0x11   : > { %479 = vmatpush3.bf16.msra.mxu0 (!%p192_p9), %v476_v3  ;;  %v354_v33 = vld [vmem:[%s766_s4] sm:$0xff] (!%p192_p9)  ;;  %s537_s9 = sshll.u32 (!%p192_p9), %s597_s7, 4  ;;  %s538_s9 = int_to_ptr.vmem [resolvable:$false] %s537_s9 }
  0x12   : > { %481 = vmatprep.subr.bf16.mxu0 (!%p192_p9), %v480_v5  ;;  %s539_s10 = scalar_lea.vmem (!%p192_p9), %s538_s9, 512 }
  0x15   : > { %s775_s11 = smov (!%p220_p10, %s441_s11), 3  ;;  %483 = vmatpush3.bf16.msra.mxu0 %v480_v5 }
  0x16   : > { %s442_s23 = sshll.u32 %s775_s11, 3  ;;  %485 = vmatprep.subr.bf16.mxu0 %v484_v8  ;;  %s440_s11 = sshll.u32 %s216_s8, 4 }
  0x17   : > { %s223_s30 = scalar_lea.vmem %s762_s0, %s442_s23  ;;  %s218_s15 = scalar_lea.vmem [#allocation2], %s440_s11 }
  0x18   : > { %v226_v9 = vld [vmem:[%s223_s30] sm:$0xff]  ;;  %v227_v10 = vld [vmem:[%s223_s30 + $0x8] sm:$0xff]  ;;  %s374_s16 = sshll.u32 %s218_s15, 4  ;;  %s717_s30 = scalar_lea.hbm %s767_s5, %s452_s14  ;;  %s719_s16 = int_to_ptr.vmem [resolvable:$true] %s374_s16 }
  0x19   : > { %473 = vmatprep.mubr.msk.f32.mxu0 %vm241_vm0, %v226_v9  ;;  %487 = vmatpush3.bf16.msra.mxu0 %v484_v8  ;;  %s533_s6 = scalar_lea.vmem %s719_s16, 256  ;;  %p540_p0 = scmp.lt.s32.totalorder %s719_s16, %s538_s9 }
  0x1a   : > { %p534_p11 = scmp.ne.s32.totalorder %s719_s16, %s533_s6  ;;  %p541_p1 = scmp.lt.s32.totalorder %s539_s10, %s533_s6 }
  0x1c   : > { %474 = vmatmul.mubr.msk.f32.vlgmr.msra.gmra.mrb[0].mxu0 %vm241_vm0, %v227_v10  ;;  %p535_p12 = pnand %p534_p11, %p668_p5  ;;  %p542_p2 = por %p541_p1, %p540_p0 }
  0x1e   : > { %p536_p13 = pneg %p535_p12 }
  0x20   : > { %p543_p3 = pnand %p542_p2, %p536_p13 }
  0xef   : > { %v475_v12 = vpop.f32.mrb[0].mxu0 }
  0xf0   : > { %v314_v13 = vpop.f32.mrb[1].mxu0  ;;  %v320_v15 = vadd.f32 %v475_v12, %v443_v11 }
  0xf1   : > { %v315_v14 = vadd.f32 %v443_v11, %v314_v13 }
  0xf3   : > { %323 = vadd.xlane.f32.xlu0 %v315_v14 }
  0xf7   : > { %325 = vadd.xlane.f32.xlu0 %v320_v15 }
 0x180   : > { %v324_v16 = vpop.xlane.xlu0 %323 }
 0x181   : > { %v327_v17 = vmul.f32 0.0078125, %v324_v16 }
 0x183   : > { %v329_v18 = vsub.f32 %v315_v14, %v327_v17 }
 0x184   : > { %v326_v19 = vpop.xlane.xlu0 %325 }
 0x185   : > { %v328_v20 = vmul.f32 0.0078125, %v326_v19  ;;  %v331_v21 = vmul.f32 %v329_v18, %v329_v18 }
 0x187   : > { %v330_v22 = vsub.f32 %v320_v15, %v328_v20  ;;  %333 = vadd.xlane.f32.xlu1 %v331_v21 }
 0x189   : > { %v332_v23 = vmul.f32 %v330_v22, %v330_v22 }
 0x18b   : > { %335 = vadd.xlane.f32.xlu1 %v332_v23 }
 0x214   : > { %v334_v24 = vpop.xlane.xlu1 %333 }
 0x215   : > { %v337_v25 = vmul.f32 0.0078125, %v334_v24 }
 0x217   : > { %v339_v26 = vadd.f32 1e-05, %v337_v25 }
 0x218   : > { %v336_v27 = vpop.xlane.xlu1 %335 }
 0x219   : > { %529 = vrsqrt.f32 %v339_v26  ;;  %v338_v28 = vmul.f32 0.0078125, %v336_v27 }
 0x21b   : > { %v340_v29 = vadd.f32 1e-05, %v338_v28 }
 0x21d   : > { %531 = vrsqrt.f32 %v340_v29 }
 0x223   : > { %v530_v30 = vpop.eup %529 }
 0x224   : > { %v343_v32 = vmul.f32 %v530_v30, %v329_v18 }
 0x226   : > { %v352_v34 = vmul.f32 %v446_v31, %v343_v32 }
 0x227   : > { %v532_v35 = vpop.eup %531 }
 0x228   : > { %v344_v36 = vmul.f32 %v532_v35, %v330_v22  ;;  %v356_v37 = vadd.f32 %v354_v33, %v352_v34 }
 0x22a   : > { %v353_v39 = vmul.f32 %v446_v31, %v344_v36  ;;  %358 = vst [vmem:[%s218_s15] sm:$0xff] %v356_v37 }
 0x22c   : > { %v357_v40 = vadd.f32 %v355_v38, %v353_v39 }
 0x22e   : > { %359 = vst [vmem:[%s218_s15 + $0x8] sm:$0xff] %v357_v40 }
 0x22f   : > { %546 = shalt.err (!%p543_p3)
}
 0x230   : > { %s547_s8 = scalar_lea.hbm %s717_s30, 256  ;;  %s551_s13 = scalar_lea.hbm %s767_s5, 512 }
 0x231   : > { %p548_p4 = scmp.ne.s32.totalorder %s717_s30, %s547_s8  ;;  %p552_p9 = scmp.lt.u32.totalorder %s717_s30, %s767_s5 }
 0x232   : > { %p553_p10 = scmp.lt.u32.totalorder %s551_s13, %s547_s8  ;;  %p555_p12 = scmp.lt.u32.totalorder %s547_s8, %s717_s30 }
 0x233   : > { %p549_p7 = pnand %p548_p4, %p668_p5 }
 0x234   : > { %p554_p11 = por %p553_p10, %p552_p9 }
 0x235   : > { %p550_p8 = pneg %p549_p7 }
 0x236   : > { %p556_p13 = por %p555_p12, %p554_p11 }
 0x238   : > { %p557_p0 = pnand %p556_p13, %p550_p8 }
 0x23a   : > { %560 = shalt.err (!%p557_p0)
}
 0x23b   : > { %s598_s17 = smov 128   ;;  %s599_s23 = smov 8  }
 0x23c   : > { %488 = dma.vmem_to_hbm [thread:$0]  (%p668_p5), %s719_s16, 256, %s717_s30, %s721_s22, %s598_s17, %s598_s17, %s599_s23  }
 0x23d PF: > { %p494_p1 = scmp.ge.s32.totalorder %s595_s21, 2  ;;  %s389_s25 = sand.u32 1, %s583_s18  }
 0x23e   : > { %s390_s26 = scalar_lea.sflag [#allocation3], %s389_s25 }
 0x23f   : > { %p491_p2 = pnand %p494_p1, %p672_p6 }
 0x241   : > { %578 = dma.done.wait (!%p491_p2), %s390_s26, 256  }
 0x242   : > { %580 = vsyncadd (!%p491_p2), %s390_s26, 4294967040  ;;  %p15_p3 = scmp.ge.s32.totalorder %s655_s24, 4   ;;  %s770_s18 = smov %s587_s19 }
 0x243   : > { %s771_s19 = smov %s591_s20  ;;  %s772_s20 = smov %s666_s27 }
 0x244   : > { %s773_s21 = smov %s655_s24  ;;  %17 = sbr.rel (!%p15_p3) target bundleno = 3 (0x3), region = 75 }
 0x24b   :  { %395 = vsyncpa [#allocation3], 1 }
 0x24c   :  { %397 = vsyncpa [#allocation3 + $0x1], 1 }

</bundles_post_ra>
